<compile_context>
chip_gen: v6e
topology: v6e:2x2x1
jax: 0.10.0
libtpu: 0.0.40
codegen_flags: <defaults>
</compile_context>

<pallas_src>
import jax
import jax.numpy as jnp
from jax.experimental import pallas as pl
from jax.experimental.pallas import tpu as pltpu


def _vmem_budget_bytes():
    """~3/4 of physical VMEM: ~96 MiB on v5e/v6e (128 MiB), ~48 MiB on v7x."""
    try:
        vmem_cap = int(pltpu.get_tpu_info().vmem_capacity_bytes)
    except Exception:
        vmem_cap = 64 * 1024 * 1024  # conservative fallback (v7x-sized)
    return max(min(vmem_cap * 3 // 4, vmem_cap - 16 * 1024 * 1024),
               32 * 1024 * 1024)


def _choose_block_b(B, L, Da, Dq, A, pre_bytes, vmem_budget, min_grid_steps):
    """Pick the batch tile: ~4 MiB precompute writeback per step, >=512 flat
    MXU rows, capped by the double-buffered VMEM footprint and the batch."""
    tb = max((4 * 1024 * 1024) // max(L * A * pre_bytes, 1),   # ~4 MiB writeback
             pl.cdiv(512, L))                                  # tb*L >= 512 rows
    # Double-buffered f32 ctx tile + precompute tile + energy tile + input tile
    # per batch row, plus the resident weights/biases, must fit the budget.
    fixed = 2 * 4 * (Da * A + Dq * A + 3 * A + 8)
    per_row = 2 * (L * Da * 4 + L * A * pre_bytes + L * 4 + Dq * 4)
    tb = min(tb, max((vmem_budget - fixed) // per_row, 8))
    if min_grid_steps > 1:
        # Keep >= min_grid_steps grid steps (set 2 on v7x so both TensorCores
        # get work from the 'parallel' batch axis).
        tb = min(tb, max(pl.cdiv(B, min_grid_steps), 8))
    tb = min(tb, B)
    if tb < B:
        # bf16 packs 16 rows per sublane group; keep partial tiles 16-aligned.
        tb = max((tb // 16) * 16, 8)
    return int(max(tb, 1))


def score_attention(inp, ctx, w_pre, b_pre, w_q, b_q, w_v, b_v, *,
                    block_b=None,
                    matmul_dtype=jnp.bfloat16,
                    precompute_dtype=jnp.float32,
                    min_grid_steps=1,
                    context_buffers=2):
    """inp: (B, Dq), ctx: (B, L, Da). Weights are (in, out)-layout."""
    B, Dq = inp.shape
    _, L, Da = ctx.shape
    A = w_pre.shape[1]

    pre_bytes = jnp.dtype(precompute_dtype).itemsize
    vmem_budget = _vmem_budget_bytes()

    if block_b is None:
        tb = _choose_block_b(B, L, Da, Dq, A, pre_bytes, vmem_budget,
                             min_grid_steps)
    else:
        tb = min(int(block_b), B)
        if tb < B:
            tb = max((tb // 8) * 8, 8)   # keep the sublane constraint
    grid = (pl.cdiv(B, tb),)

    # Inputs stay f32 in HBM; the kernel casts to the MXU dtype in VMEM (no
    # extra HBM pass).  Only the tiny, grid-resident weights are cast here.
    ctx_flat = ctx.reshape(B * L, Da)                       # free (row-major)
    wdt = matmul_dtype if matmul_dtype is not None else jnp.float32
    w_pre_m = w_pre.astype(wdt)
    w_q_m = w_q.astype(wdt)
    b_pre2 = b_pre.reshape(1, A).astype(jnp.float32)
    b_q2 = b_q.reshape(1, A).astype(jnp.float32)
    w_v2 = w_v.reshape(1, A).astype(jnp.float32)
    b_v2 = b_v.reshape(1, 1).astype(jnp.float32)

    mxu_dtype = matmul_dtype

    def kernel(inp_ref, ctx_ref, wpre_ref, bpre_ref, wq_ref, bq_ref,
               wv_ref, bv_ref, energy_ref, pre_ref):
        tb_k = inp_ref.shape[0]
        a = wpre_ref.shape[1]
        l = ctx_ref.shape[0] // tb_k

        ctx_t = ctx_ref[...]
        inp_t = inp_ref[...]
        if mxu_dtype is not None:
            # Cast f32 -> MXU dtype in VMEM; hidden under DMA, no HBM pass.
            ctx_t = ctx_t.astype(mxu_dtype)
            inp_t = inp_t.astype(mxu_dtype)

        # precompute = linear_pre(context): flat (tb*L, Da) @ (Da, A) on the
        # MXU, f32 accumulation, f32 bias add.
        pre = jnp.dot(ctx_t, wpre_ref[...],
                      preferred_element_type=jnp.float32) + bpre_ref[...]

        # targetT = linear_q(input): (tb, A), broadcast over L below.
        q = jnp.dot(inp_t, wq_ref[...],
                    preferred_element_type=jnp.float32) + bq_ref[...]

        # tmp = tanh(precompute + targetT)
        # TODO(synk): on v6e/v7x this add+tanh could run in bf16 (bf16 VPU/EUP);
        # kept f32 so the same kernel is exact on v5e.
        tmp = jnp.tanh(pre.reshape(tb_k, l, a) + q[:, None, :])   # (tb, L, A)

        # energy = linear_v(tmp): VPU multiply + lane reduction; scalar bias
        # from SMEM (softmax is invariant to it, kept for module semantics).
        energy = jnp.sum(tmp * wv_ref[...], axis=-1) + bv_ref[0, 0]  # (tb, L)

        # softmax over the source length (dim=1 of the original module);
        # exact division so rows sum to 1.
        m = jnp.max(energy, axis=-1, keepdims=True)
        e = jnp.exp(energy - m)
        s = jnp.sum(e, axis=-1, keepdims=True)
        energy_ref[...] = e / s

        pre_ref[...] = pre.astype(pre_ref.dtype)

    # TODO(synk): when att_dim A is not a multiple of 128 the (tb*L, A) store
    # is lane-masked; a lane-dense (tb, L*A) slab would need an in-kernel
    # (tb*L, A)->(tb, L*A) relayout whose Mosaic reshape support is not
    # guaranteed, so it is left out here.
    out_shape = (
        jax.ShapeDtypeStruct((B, L), jnp.float32),            # energy (softmaxed)
        jax.ShapeDtypeStruct((B * L, A), precompute_dtype),   # precompute (flat)
    )

    if context_buffers and context_buffers != 2:
        # v7x knob: a third context buffer if xprof shows exposed DMA.
        ctx_spec = pl.BlockSpec((tb * L, Da), lambda i: (i, 0),
                                pipeline_mode=pl.Buffered(int(context_buffers)))
    else:
        ctx_spec = pl.BlockSpec((tb * L, Da), lambda i: (i, 0))

    grid_spec = pltpu.PrefetchScalarGridSpec(
        num_scalar_prefetch=0,
        grid=grid,
        in_specs=[
            pl.BlockSpec((tb, Dq), lambda i: (i, 0)),           # input (batch tile)
            ctx_spec,                                           # context (flat tile)
            pl.BlockSpec((Da, A), lambda i: (0, 0)),            # w_pre (resident)
            pl.BlockSpec((1, A), lambda i: (0, 0)),             # b_pre (resident)
            pl.BlockSpec((Dq, A), lambda i: (0, 0)),            # w_q (resident)
            pl.BlockSpec((1, A), lambda i: (0, 0)),             # b_q (resident)
            pl.BlockSpec((1, A), lambda i: (0, 0)),             # w_v (resident)
            pl.BlockSpec(memory_space=pltpu.MemorySpace.SMEM),  # b_v scalar
        ],
        out_specs=[
            pl.BlockSpec((tb, L), lambda i: (i, 0)),
            pl.BlockSpec((tb * L, A), lambda i: (i, 0)),
        ],
    )

    cost = pl.CostEstimate(
        flops=2 * B * L * Da * A + 2 * B * Dq * A + 4 * B * L * A,
        transcendentals=B * L * A + B * L,
        bytes_accessed=(B * L * Da * 4 + B * Dq * 4
                        + 4 * (Da * A + Dq * A + 3 * A + 1)
                        + B * L * A * pre_bytes + B * L * 4),
    )

    energy, pre_flat = pl.pallas_call(
        kernel,
        out_shape=out_shape,
        grid_spec=grid_spec,
        compiler_params=pltpu.CompilerParams(
            dimension_semantics=("parallel",),
            vmem_limit_bytes=int(vmem_budget),
        ),
        cost_estimate=cost,
    )(inp, ctx_flat, w_pre_m, b_pre2, w_q_m, b_q2, w_v2, b_v2)

    # TODO(synk): the optional applyMask() path of the module (mask=None by
    # default) is not implemented.
    return energy, pre_flat.reshape(B, L, A)


def _reference(inp, ctx, w_pre, b_pre, w_q, b_q, w_v, b_v, matmul_dtype=None):
    if matmul_dtype is not None:
        ctx = ctx.astype(matmul_dtype)
        inp = inp.astype(matmul_dtype)
        w_pre = w_pre.astype(matmul_dtype)
        w_q = w_q.astype(matmul_dtype)
    pre = jnp.einsum("bld,da->bla", ctx, w_pre,
                     preferred_element_type=jnp.float32) + b_pre
    q = jnp.dot(inp, w_q, preferred_element_type=jnp.float32) + b_q
    tmp = jnp.tanh(pre + q[:, None, :])
    energy = jnp.einsum("bla,a->bl", tmp, w_v.reshape(-1)) + b_v.reshape(())
    return jax.nn.softmax(energy, axis=1), pre


if __name__ == "__main__":
    # Small shapes consistent with the module: sourceL=8, attend/query/att=32.
    B, L, ATTEND, QUERY, ATT = 16, 8, 32, 32, 32

    key = jax.random.PRNGKey(0)
    ks = jax.random.split(key, 8)

    def uinit(k, shape, fan_in):
        bound = 1.0 / (fan_in ** 0.5)
        return jax.random.uniform(k, shape, jnp.float32, -bound, bound)

    w_pre = uinit(ks[0], (ATTEND, ATT), ATTEND)        # linear_pre.weight.T
    b_pre = uinit(ks[1], (ATT,), ATTEND)
    w_q = uinit(ks[2], (QUERY, ATT), QUERY)            # linear_q.weight.T
    b_q = uinit(ks[3], (ATT,), QUERY)
    w_v = uinit(ks[4], (1, ATT), ATT)                  # linear_v.weight
    b_v = uinit(ks[5], (1,), ATT)

    inp = jax.random.normal(ks[6], (B, QUERY), jnp.float32)
    ctx = jax.random.normal(ks[7], (B, L, ATTEND), jnp.float32)

    # --- default config: single batch tile covering the whole (tiny) batch ---
    energy, precompute = score_attention(inp, ctx, w_pre, b_pre, w_q, b_q,
                                         w_v, b_v)
    jax.block_until_ready((energy, precompute))

    # Tight check vs a reference using the same bf16 MXU operands / f32 accum.
    e_bf16, p_bf16 = _reference(inp, ctx, w_pre, b_pre, w_q, b_q, w_v, b_v,
                                matmul_dtype=jnp.bfloat16)
    assert jnp.allclose(precompute, p_bf16, atol=1e-4, rtol=1e-4)
    assert jnp.allclose(energy, e_bf16, atol=5e-3)
    # Exact softmax normalization (division, not approx reciprocal).
    assert jnp.allclose(jnp.sum(energy, axis=1), 1.0, atol=1e-5)

    # Loose check against pure-f32 module semantics.
    e_f32, p_f32 = _reference(inp, ctx, w_pre, b_pre, w_q, b_q, w_v, b_v)
    assert jnp.allclose(precompute, p_f32, atol=5e-2)
    assert jnp.allclose(energy, e_f32, atol=5e-2)

    # --- multi-step grid with a padded tail + bf16 precompute writeback ---
    B2 = 40
    inp2 = jax.random.normal(ks[6], (B2, QUERY), jnp.float32)
    ctx2 = jax.random.normal(ks[7], (B2, L, ATTEND), jnp.float32)
    e2, p2 = score_attention(inp2, ctx2, w_pre, b_pre, w_q, b_q, w_v, b_v,
                             block_b=16, precompute_dtype=jnp.bfloat16)
    jax.block_until_ready((e2, p2))
    e2_ref, p2_ref = _reference(inp2, ctx2, w_pre, b_pre, w_q, b_q, w_v, b_v,
                                matmul_dtype=jnp.bfloat16)
    assert jnp.allclose(p2.astype(jnp.float32), p2_ref, atol=2e-2)
    assert jnp.allclose(e2, e2_ref, atol=5e-3)
    assert jnp.allclose(jnp.sum(e2, axis=1), 1.0, atol=1e-5)

    print("KERNEL_OK")
</pallas_src>

<mosaic_0001>
module attributes {stable_mosaic.version = 11 : i64} {
  func.func @kernel(%arg0: i32, %arg1: memref<16x32xf32, #tpu.memory_space<vmem>>, %arg2: memref<128x32xf32, #tpu.memory_space<vmem>>, %arg3: memref<32x32xbf16, #tpu.memory_space<vmem>>, %arg4: memref<1x32xf32, #tpu.memory_space<vmem>>, %arg5: memref<32x32xbf16, #tpu.memory_space<vmem>>, %arg6: memref<1x32xf32, #tpu.memory_space<vmem>>, %arg7: memref<1x32xf32, #tpu.memory_space<vmem>>, %arg8: memref<1x1xf32, #tpu.memory_space<smem>>, %arg9: memref<16x8xf32, #tpu.memory_space<vmem>>, %arg10: memref<128x32xf32, #tpu.memory_space<vmem>>) attributes {dimension_semantics = [#tpu.dimension_semantics<parallel>], iteration_bounds = array<i64: 1>, scalar_prefetch = 0 : i64, scratch_operands = 0 : i64, tpu.core_type = #tpu.core_type<tc>, window_params = [{transform_indices = @transform_0, window_bounds = array<i64: 16, 32>}, {transform_indices = @transform_1, window_bounds = array<i64: 128, 32>}, {pipeline_mode = #tpu.pipeline_mode<synchronous>, transform_indices = @transform_2, window_bounds = array<i64: 32, 32>}, {pipeline_mode = #tpu.pipeline_mode<synchronous>, transform_indices = @transform_3, window_bounds = array<i64: 1, 32>}, {pipeline_mode = #tpu.pipeline_mode<synchronous>, transform_indices = @transform_4, window_bounds = array<i64: 32, 32>}, {pipeline_mode = #tpu.pipeline_mode<synchronous>, transform_indices = @transform_5, window_bounds = array<i64: 1, 32>}, {pipeline_mode = #tpu.pipeline_mode<synchronous>, transform_indices = @transform_6, window_bounds = array<i64: 1, 32>}, {transform_indices = @transform_7, window_bounds = array<i64: 1, 1>}, {transform_indices = @transform_8, window_bounds = array<i64: 16, 8>}, {transform_indices = @transform_9, window_bounds = array<i64: 128, 32>}]} {
    %c0 = arith.constant 0 : index
    %c0_0 = arith.constant 0 : index
    %0 = vector.load %arg2[%c0, %c0_0] : memref<128x32xf32, #tpu.memory_space<vmem>>, vector<128x32xf32>
    %c0_1 = arith.constant 0 : index
    %c0_2 = arith.constant 0 : index
    %1 = vector.load %arg1[%c0_1, %c0_2] : memref<16x32xf32, #tpu.memory_space<vmem>>, vector<16x32xf32>
    %2 = arith.truncf %0 : vector<128x32xf32> to vector<128x32xbf16>
    %3 = arith.truncf %1 : vector<16x32xf32> to vector<16x32xbf16>
    %c0_3 = arith.constant 0 : index
    %c0_4 = arith.constant 0 : index
    %4 = vector.load %arg3[%c0_3, %c0_4] : memref<32x32xbf16, #tpu.memory_space<vmem>>, vector<32x32xbf16>
    %cst = arith.constant dense<0.000000e+00> : vector<128x32xf32>
    %5 = tpu.matmul %2, %4, %cst {dimension_numbers = #tpu.dot_dimension_numbers<[1], [0], [0], [1], [0, 0, 1, 1], [], []>} : vector<128x32xbf16>, vector<32x32xbf16>, vector<128x32xf32> -> vector<128x32xf32>
    %c0_5 = arith.constant 0 : index
    %c0_6 = arith.constant 0 : index
    %6 = vector.load %arg4[%c0_5, %c0_6] : memref<1x32xf32, #tpu.memory_space<vmem>>, vector<1x32xf32>
    %7 = vector.broadcast %6 : vector<1x32xf32> to vector<128x32xf32>
    %8 = arith.addf %5, %7 : vector<128x32xf32>
    %c0_7 = arith.constant 0 : index
    %c0_8 = arith.constant 0 : index
    %9 = vector.load %arg5[%c0_7, %c0_8] : memref<32x32xbf16, #tpu.memory_space<vmem>>, vector<32x32xbf16>
    %cst_9 = arith.constant dense<0.000000e+00> : vector<16x32xf32>
    %10 = tpu.matmul %3, %9, %cst_9 {dimension_numbers = #tpu.dot_dimension_numbers<[1], [0], [0], [1], [0, 0, 1, 1], [], []>} : vector<16x32xbf16>, vector<32x32xbf16>, vector<16x32xf32> -> vector<16x32xf32>
    %c0_10 = arith.constant 0 : index
    %c0_11 = arith.constant 0 : index
    %11 = vector.load %arg6[%c0_10, %c0_11] : memref<1x32xf32, #tpu.memory_space<vmem>>, vector<1x32xf32>
    %12 = vector.broadcast %11 : vector<1x32xf32> to vector<16x32xf32>
    %13 = arith.addf %10, %12 : vector<16x32xf32>
    %14 = vector.shape_cast %8 : vector<128x32xf32> to vector<16x8x32xf32>
    %15 = vector.shape_cast %13 : vector<16x32xf32> to vector<16x1x32xf32>
    %16 = vector.broadcast %15 : vector<16x1x32xf32> to vector<16x8x32xf32>
    %17 = arith.addf %14, %16 : vector<16x8x32xf32>
    %18 = math.tanh %17 : vector<16x8x32xf32>
    %c0_12 = arith.constant 0 : index
    %c0_13 = arith.constant 0 : index
    %19 = vector.load %arg7[%c0_12, %c0_13] : memref<1x32xf32, #tpu.memory_space<vmem>>, vector<1x32xf32>
    %20 = vector.shape_cast %19 : vector<1x32xf32> to vector<1x1x32xf32>
    %21 = vector.broadcast %20 : vector<1x1x32xf32> to vector<16x8x32xf32>
    %22 = arith.mulf %18, %21 : vector<16x8x32xf32>
    %cst_14 = arith.constant dense<0.000000e+00> : vector<16x8xf32>
    %23 = vector.multi_reduction <add>, %22, %cst_14 [2] : vector<16x8x32xf32> to vector<16x8xf32>
    %c0_15 = arith.constant 0 : index
    %c0_16 = arith.constant 0 : index
    %24 = memref.load %arg8[%c0_15, %c0_16] : memref<1x1xf32, #tpu.memory_space<smem>>
    %25 = vector.broadcast %24 : f32 to vector<16x8xf32>
    %26 = arith.addf %23, %25 : vector<16x8xf32>
    %cst_17 = arith.constant dense<0xFF800000> : vector<16xf32>
    %27 = vector.multi_reduction <maximumf>, %26, %cst_17 [1] : vector<16x8xf32> to vector<16xf32>
    %28 = vector.shape_cast %27 : vector<16xf32> to vector<16x1xf32>
    %29 = vector.broadcast %28 : vector<16x1xf32> to vector<16x8xf32>
    %30 = arith.subf %26, %29 : vector<16x8xf32>
    %31 = math.exp %30 : vector<16x8xf32>
    %cst_18 = arith.constant dense<0.000000e+00> : vector<16xf32>
    %32 = vector.multi_reduction <add>, %31, %cst_18 [1] : vector<16x8xf32> to vector<16xf32>
    %33 = vector.shape_cast %32 : vector<16xf32> to vector<16x1xf32>
    %34 = vector.broadcast %33 : vector<16x1xf32> to vector<16x8xf32>
    %35 = arith.divf %31, %34 : vector<16x8xf32>
    %c0_19 = arith.constant 0 : index
    %c0_20 = arith.constant 0 : index
    %36 = vector.load %arg9[%c0_19, %c0_20] : memref<16x8xf32, #tpu.memory_space<vmem>>, vector<16x8xf32>
    tpu.vector_store %arg9[%c0_19, %c0_20], %35 {strides = array<i32>} : memref<16x8xf32, #tpu.memory_space<vmem>>, vector<16x8xf32>,
    %c0_21 = arith.constant 0 : index
    %c0_22 = arith.constant 0 : index
    %37 = vector.load %arg10[%c0_21, %c0_22] : memref<128x32xf32, #tpu.memory_space<vmem>>, vector<128x32xf32>
    tpu.vector_store %arg10[%c0_21, %c0_22], %8 {strides = array<i32>} : memref<128x32xf32, #tpu.memory_space<vmem>>, vector<128x32xf32>,
    return
  }
  func.func @transform_0(%arg0: i32) -> (i32, i32) {
    %c0_i32 = arith.constant 0 : i32
    %c0_i32_0 = arith.constant 0 : i32
    return %arg0, %c0_i32 : i32, i32
  }
  func.func @transform_1(%arg0: i32) -> (i32, i32) {
    %c0_i32 = arith.constant 0 : i32
    %c0_i32_0 = arith.constant 0 : i32
    return %arg0, %c0_i32 : i32, i32
  }
  func.func @transform_2(%arg0: i32) -> (i32, i32) {
    %c0_i32 = arith.constant 0 : i32
    %c0_i32_0 = arith.constant 0 : i32
    %c0_i32_1 = arith.constant 0 : i32
    return %c0_i32, %c0_i32_0 : i32, i32
  }
  func.func @transform_3(%arg0: i32) -> (i32, i32) {
    %c0_i32 = arith.constant 0 : i32
    %c0_i32_0 = arith.constant 0 : i32
    %c0_i32_1 = arith.constant 0 : i32
    return %c0_i32, %c0_i32_0 : i32, i32
  }
  func.func @transform_4(%arg0: i32) -> (i32, i32) {
    %c0_i32 = arith.constant 0 : i32
    %c0_i32_0 = arith.constant 0 : i32
    %c0_i32_1 = arith.constant 0 : i32
    return %c0_i32, %c0_i32_0 : i32, i32
  }
  func.func @transform_5(%arg0: i32) -> (i32, i32) {
    %c0_i32 = arith.constant 0 : i32
    %c0_i32_0 = arith.constant 0 : i32
    %c0_i32_1 = arith.constant 0 : i32
    return %c0_i32, %c0_i32_0 : i32, i32
  }
  func.func @transform_6(%arg0: i32) -> (i32, i32) {
    %c0_i32 = arith.constant 0 : i32
    %c0_i32_0 = arith.constant 0 : i32
    %c0_i32_1 = arith.constant 0 : i32
    return %c0_i32, %c0_i32_0 : i32, i32
  }
  func.func @transform_7(%arg0: i32) -> (i32, i32) {
    %c0_i32 = arith.constant 0 : i32
    %c0_i32_0 = arith.constant 0 : i32
    %c0_i32_1 = arith.constant 0 : i32
    return %c0_i32, %c0_i32_0 : i32, i32
  }
  func.func @transform_8(%arg0: i32) -> (i32, i32) {
    %c0_i32 = arith.constant 0 : i32
    %c0_i32_0 = arith.constant 0 : i32
    return %arg0, %c0_i32 : i32, i32
  }
  func.func @transform_9(%arg0: i32) -> (i32, i32) {
    %c0_i32 = arith.constant 0 : i32
    %c0_i32_0 = arith.constant 0 : i32
    return %arg0, %c0_i32 : i32, i32
  }
}

</mosaic_0001>

<bundles_post_ra>
// kernel: tpu_custom_call.1
= control target key start
LH: loop header
LB: loop body
LE: loop exit
PB: predicated region body
PF: predicated region fallthrough
CT: control target
= control target key end

     0   :  { %vm83_vm0 = vcmask 261120   ;;  %v1416_v17 = vmov 0.0   ;;  %vm1417_vm1 = vmmov 0   ;;  %v1418_v33 = vmov 1966171168   ;;  %s2054_s2 = inlined_call_operand.vmem [shape: bf16[32,32], index: 2, kind: input, shape index: {}]   ;;  %s2055_s1 = inlined_call_operand.vmem [shape: f32[128,32], index: 1, kind: input, shape index: {}]   ;;  %s2056_s4 = inlined_call_operand.vmem [shape: bf16[32,32], index: 4, kind: input, shape index: {}]   ;;  %s2057_s0 = inlined_call_operand.vmem [shape: f32[16,32], index: 0, kind: input, shape index: {}]   ;;  %s2058_s3 = inlined_call_operand.vmem [shape: f32[1,32], index: 3, kind: input, shape index: {}]   ;;  %s2059_s9 = inlined_call_operand.vmem [shape: f32[128,32], index: 9, kind: output, shape index: {1}]   ;;  %s2060_s5 = inlined_call_operand.vmem [shape: f32[1,32], index: 5, kind: input, shape index: {}]   ;;  %s2061_s6 = inlined_call_operand.vmem [shape: f32[1,32], index: 6, kind: input, shape index: {}]   ;;  %s2062_s7 = inlined_call_operand.<no memory space> [shape: f32[1,1], index: 7, kind: input, shape index: {}]   ;;  %s2063_s8 = inlined_call_operand.vmem [shape: f32[16,8], index: 8, kind: output, shape index: {0}]  }
   0x1   :  { %v1316_v0 = vld [vmem:[%s2054_s2 + $0x8] sm:$0xff]   ;;  %v1317_v1 = vld [vmem:[%s2054_s2] sm:$0xff]   ;;  %v35_v7 = vld [vmem:[%s2055_s1 + $0x10] sm:$0xff]  ;;  %v276_v34 = vunpack.c.l.s4 %v1418_v33  ;;  %v278_v35 = vlaneseq  ;;  %vm655_vm2 = vcmask 1041409   ;;  %vm657_vm3 = vcmask 1042434  }
   0x2   :  { %1278 = vmatprep.subr.bf16.mxu0 %v1316_v0  ;;  %1306 = vmatprep.subr.bf16.mxu1 %v1316_v0  ;;  %v33_v2 = vld [vmem:[%s2055_s1] sm:$0xff]  ;;  %v34_v3 = vld [vmem:[%s2055_s1 + $0x8] sm:$0xff]  ;;  %v36_v8 = vld [vmem:[%s2055_s1 + $0x18] sm:$0xff]  ;;  %vm659_vm4 = vcmask 1043459   ;;  %vm661_vm5 = vcmask 1044484   ;;  %vm663_vm6 = vcmask 1045509  }
   0x3   :  { %v45_v4 = vld [vmem:[%s2055_s1 + $0x60] sm:$0xff]  ;;  %1279 = vmatpush3.bf16.msra.mxu0 %v1316_v0  ;;  %1308 = vmatpush3.bf16.msra.mxu1 %v1316_v0  ;;  %v51_v5 = vpack.c.bf16 %v34_v3, %v33_v2  ;;  %v46_v6 = vld [vmem:[%s2055_s1 + $0x68] sm:$0xff]  ;;  %v47_v10 = vld [vmem:[%s2055_s1 + $0x70] sm:$0xff]  ;;  %v52_v12 = vpack.c.bf16 %v36_v8, %v35_v7  ;;  %v277_v44 = vunpack.c.0.s8 %v276_v34  ;;  %v1571_v45 = vshrl.u32 %v278_v35, 7 }
   0x4   :  { %1280 = vmatprep.subr.bf16.mxu0 %v1317_v1  ;;  %1307 = vmatprep.subr.bf16.mxu1 %v1317_v1  ;;  %v57_v9 = vpack.c.bf16 %v46_v6, %v45_v4  ;;  %v48_v11 = vld [vmem:[%s2055_s1 + $0x78] sm:$0xff]  ;;  %v37_v14 = vld [vmem:[%s2055_s1 + $0x20] sm:$0xff]  ;;  %v1318_v15 = vld [vmem:[%s2056_s4 + $0x8] sm:$0xff]   ;;  %vm665_vm7 = vcmask 1046534   ;;  %vm667_vm8 = vcmask 1047559   ;;  %vm678_vm9 = vcmask 64512  }
   0x5   :  { %1282 = vmatprep.mubr.msk.bf16.mxu0 %vm83_vm0, %v51_v5  ;;  %v58_v13 = vpack.c.bf16 %v48_v11, %v47_v10  ;;  %v38_v16 = vld [vmem:[%s2055_s1 + $0x28] sm:$0xff]  ;;  %v1319_v19 = vld [vmem:[%s2056_s4] sm:$0xff]   ;;  %v39_v20 = vld [vmem:[%s2055_s1 + $0x30] sm:$0xff]  ;;  %v1606_v55 = vsub.s32 %v277_v44, %v1571_v45  ;;  %v1627_v0 = vsub.s32 0, %v1571_v45 }
   0x6   :  { %1294 = vmatprep.mubr.msk.bf16.mxu1 %vm83_vm0, %v57_v9  ;;  %v53_v18 = vpack.c.bf16 %v38_v16, %v37_v14  ;;  %v40_v21 = vld [vmem:[%s2055_s1 + $0x38] sm:$0xff]  ;;  %v49_v22 = vld [vmem:[%s2057_s0] sm:$0xff]  ;;  %v50_v23 = vld [vmem:[%s2057_s0 + $0x8] sm:$0xff] }
   0x7   :  { %1281 = vmatpush3.bf16.msra.mxu0 %v1317_v1  ;;  %1309 = vmatpush3.bf16.msra.mxu1 %v1317_v1  ;;  %v41_v24 = vld [vmem:[%s2055_s1 + $0x40] sm:$0xff]  ;;  %v42_v25 = vld [vmem:[%s2055_s1 + $0x48] sm:$0xff]  ;;  %v54_v26 = vpack.c.bf16 %v40_v21, %v39_v20  ;;  %v59_v27 = vpack.c.bf16 %v50_v23, %v49_v22  ;;  %v43_v29 = vld [vmem:[%s2055_s1 + $0x50] sm:$0xff] }
   0x8   :  { %1298 = vmatprep.subr.bf16.mxu1 %v1416_v17  ;;  %v55_v28 = vpack.c.bf16 %v42_v25, %v41_v24  ;;  %v44_v30 = vld [vmem:[%s2055_s1 + $0x58] sm:$0xff]  ;;  %v1548_v32 = vld [vmem:[%s2058_s3] ss:$0 sm:$0xff] }
   0x9   :  { %v56_v31 = vpack.c.bf16 %v44_v30, %v43_v29  ;;  %v1260_v52 = vld [vmem:[%s2060_s5] ss:$0 sm:$0xff] }
   0xa   :  { %1283 = vmatmul.mubr.msk.bf16.vlgmr.msra.gmra.mxu0 %vm83_vm0, %v52_v12  ;;  %1295 = vmatmul.mubr.msk.bf16.vlgmr.msra.gmra.mxu1 %vm83_vm0, %v58_v13 }
   0xb   :  { %1299 = vmatpush3.bf16.msra.mxu1 %v1318_v15  ;;  %1286 = vmatprep.mubr.msk.bf16.mxu0 %vm83_vm0, %v53_v18 }
   0xc   :  { %1300 = vmatprep.subr.bf16.mxu1 %v1416_v17  ;;  %1302 = vmatprep.mubr.msk.bf16.mxu1 %vm1417_vm1, %v1416_v17 }
   0xf   :  { %1301 = vmatpush3.bf16.msra.mxu1 %v1319_v19 }
  0x12   :  { %1287 = vmatmul.mubr.msk.bf16.gmra.mxu0 %vm83_vm0, %v54_v26  ;;  %1303 = vmatmul.mubr.msk.bf16.vlgmr.msra.gmra.mxu1 %vm83_vm0, %v59_v27 }
  0x13   :  { %1290 = vmatprep.mubr.msk.bf16.mxu0 %vm83_vm0, %v55_v28 }
  0x1a   :  { %1291 = vmatmul.mubr.msk.bf16.gmra.mxu0 %vm83_vm0, %v56_v31 }
  0xca   :  { %v1284_v36 = vpop.f32.mrf.mxu0  ;;  %v1296_v37 = vpop.f32.mrf.mxu1 }
  0xcb   :  { %v1551_v38 = vadd.f32 %v1284_v36, %v1548_v32  ;;  %v1554_v39 = vadd.f32 %v1296_v37, %v1548_v32 }
  0xcc   :  { %v142_v40 = vpop.f32.mrf.mxu0  ;;  %v190_v41 = vpop.f32.mrf.mxu1 }
  0xcd   :  { %1227 = vst.msk [vmem:[%s2059_s9 + $0x10] sm:$0xff] %vm83_vm0, %v1551_v38  ;;  %1239 = vst.msk [vmem:[%s2059_s9 + $0x70] sm:$0xff] %vm83_vm0, %v1554_v39  ;;  %v143_v42 = vadd.f32 %v1548_v32, %v142_v40  ;;  %v1568_v43 = vadd.f32 %v1548_v32, %v190_v41 }
  0xce   :  { %v1285_v46 = vpop.f32.mrf.mxu0  ;;  %v1297_v47 = vpop.f32.mrf.mxu1 }
  0xcf   :  { %1225 = vst.msk [vmem:[%s2059_s9] sm:$0xff] %vm83_vm0, %v143_v42  ;;  %1237 = vst.msk [vmem:[%s2059_s9 + $0x60] sm:$0xff] %vm83_vm0, %v1568_v43  ;;  %v1583_v48 = vadd.f32 %v1285_v46, %v1548_v32  ;;  %v1586_v49 = vadd.f32 %v1297_v47, %v1548_v32 }
  0xd0   :  { %v145_v50 = vpop.f32.mrf.mxu0  ;;  %v193_v51 = vpop.f32.mrf.mxu1 }
  0xd1   :  { %1228 = vst.msk [vmem:[%s2059_s9 + $0x18] sm:$0xff] %vm83_vm0, %v1583_v48  ;;  %1240 = vst.msk [vmem:[%s2059_s9 + $0x78] sm:$0xff] %vm83_vm0, %v1586_v49  ;;  %v146_v53 = vadd.f32 %v1548_v32, %v145_v50  ;;  %v1603_v54 = vadd.f32 %v1548_v32, %v193_v51 }
  0xd2   :  { %v1288_v56 = vpop.f32.mrf.mxu0  ;;  %v265_v57 = vpop.f32.mrf.mxu1 }
  0xd3   :  { %1226 = vst.msk [vmem:[%s2059_s9 + $0x8] sm:$0xff] %vm83_vm0, %v146_v53  ;;  %1238 = vst.msk [vmem:[%s2059_s9 + $0x68] sm:$0xff] %vm83_vm0, %v1603_v54  ;;  %v1618_v58 = vadd.f32 %v1288_v56, %v1548_v32  ;;  %v266_v59 = vadd.f32 %v1260_v52, %v265_v57 }
  0xd4   :  { %v158_v60 = vpop.f32.mrf.mxu0  ;;  %v1304_v61 = vpop.f32.mrf.mxu1 }
  0xd5   :  { %1231 = vst.msk [vmem:[%s2059_s9 + $0x30] sm:$0xff] %vm83_vm0, %v1618_v58  ;;  %v274_v62 = vcombine.high %v266_v59, %v266_v59  ;;  %v281_v63 = vrot.slane %v266_v59, %v1606_v55  ;;  %v159_v1 = vadd.f32 %v1548_v32, %v158_v60  ;;  %v1687_v60 = vld [vmem:[%s2061_s6] ss:$0 sm:$0xff] }
  0xd6   :  { %v1289_v2 = vpop.f32.mrf.mxu0  ;;  %v268_v3 = vpop.f32.mrf.mxu1 }
  0xd7   :  { %v288_v4 = vrot.slane %v274_v62, %v1606_v55  ;;  %v289_v5 = vcombine.high %v281_v63, %v281_v63  ;;  %v297_v6 = vrot.slane %v281_v63, %v1606_v55  ;;  %1229 = vst.msk [vmem:[%s2059_s9 + $0x20] sm:$0xff] %vm83_vm0, %v159_v1  ;;  %v1637_v7 = vadd.f32 %v1289_v2, %v1548_v32 }
  0xd8   :  { %v269_v8 = vadd.f32 %v1260_v52, %v268_v3  ;;  %v161_v9 = vpop.f32.mrf.mxu0  ;;  %v1305_v10 = vpop.f32.mrf.mxu1 }
  0xd9   :  { %v311_v11 = vrot.slane %v289_v5, %v1606_v55  ;;  %v319_v12 = vcombine.high %v297_v6, %v297_v6  ;;  %v375_v13 = vrot.slane %v297_v6, %v1627_v0  ;;  %1232 = vst.msk [vmem:[%s2059_s9 + $0x38] sm:$0xff] %vm83_vm0, %v1637_v7  ;;  %v304_v14 = vrot.slane %v288_v4, %v1606_v55 }
  0xda   :  { %v323_v15 = vcombine.high %v269_v8, %v269_v8  ;;  %v162_v16 = vadd.f32 %v1548_v32, %v161_v9  ;;  %v1292_v17 = vpop.f32.mrf.mxu0  ;;  %v290_v21 = vcombine.high %v288_v4, %v288_v4  ;;  %v330_v23 = vrot.slane %v269_v8, %v1606_v55 }
  0xdb   :  { %v379_v18 = vrot.slane %v311_v11, %v1627_v0  ;;  %v383_v19 = vrot.slane %v319_v12, %v1627_v0  ;;  %v452_v20 = vadd.f32 %v375_v13, %v143_v42  ;;  %v321_v22 = vcombine.high %v311_v11, %v311_v11 }
  0xdc   :  { %1230 = vst.msk [vmem:[%s2059_s9 + $0x28] sm:$0xff] %vm83_vm0, %v162_v16  ;;  %v391_v26 = vrot.slane %v304_v14, %v1627_v0  ;;  %v174_v27 = vpop.f32.mrf.mxu0  ;;  %v337_v28 = vrot.slane %v323_v15, %v1606_v55  ;;  %v318_v29 = vrot.slane %v290_v21, %v1606_v55  ;;  %v346_v33 = vrot.slane %v330_v23, %v1606_v55 }
  0xdd   :  { %v453_v24 = vadd.f32 %v379_v18, %v146_v53  ;;  %v454_v25 = vadd.f32 %v383_v19, %v1551_v38  ;;  %1320 = vtanh.f32 %v452_v20  ;;  %v387_v30 = vrot.slane %v321_v22, %v1627_v0 }
  0xde   :  { %v456_v31 = vadd.f32 %v391_v26, %v159_v1  ;;  %v1293_v34 = vpop.f32.mrf.mxu0  ;;  %v338_v36 = vcombine.high %v330_v23, %v330_v23  ;;  %v1662_v37 = vrot.slane %v337_v28, %v1606_v55  ;;  %v320_v38 = vcombine.high %v304_v14, %v304_v14 }
  0xdf   :  { %1322 = vtanh.f32 %v453_v24  ;;  %v183_v40 = vadd.f32 %v1292_v17, %v1548_v32  ;;  %v455_v41 = vadd.f32 %v387_v30, %v1583_v48  ;;  %v395_v42 = vrot.slane %v318_v29, %v1627_v0 }
  0xe0   :  { %1324 = vtanh.f32 %v454_v25  ;;  %v368_v44 = vcombine.high %v346_v33, %v346_v33  ;;  %v177_v46 = vpop.f32.mrf.mxu0  ;;  %v360_v47 = vrot.slane %v338_v36, %v1606_v55  ;;  %v423_v50 = vrot.slane %v1662_v37, %v1627_v0 }
  0xe1   :  { %1326 = vtanh.f32 %v456_v31  ;;  %1235 = vst.msk [vmem:[%s2059_s9 + $0x50] sm:$0xff] %vm83_vm0, %v183_v40  ;;  %v175_v51 = vadd.f32 %v1548_v32, %v174_v27  ;;  %v407_v52 = vrot.slane %v346_v33, %v1627_v0  ;;  %v186_v53 = vadd.f32 %v1293_v34, %v1548_v32 }
  0xe2   :  { %v415_v48 = vrot.slane %v368_v44, %v1627_v0  ;;  %v399_v56 = vrot.slane %v320_v38, %v1627_v0  ;;  %v178_v59 = vadd.f32 %v1548_v32, %v177_v46  ;;  %1328 = vtanh.f32 %v455_v41 }
  0xe3   :  { %v460_v57 = vadd.f32 %v407_v52, %v175_v51  ;;  %1233 = vst.msk [vmem:[%s2059_s9 + $0x40] sm:$0xff] %vm83_vm0, %v175_v51  ;;  %v322_v61 = vcombine.high %v318_v29, %v318_v29  ;;  %v457_v62 = vadd.f32 %v395_v42, %v162_v16  ;;  %1236 = vst.msk [vmem:[%s2059_s9 + $0x58] sm:$0xff] %vm83_vm0, %v186_v53 }
  0xe4   :  { %v462_v63 = vadd.f32 %v415_v48, %v183_v40  ;;  %v339_v2 = vcombine.high %v337_v28, %v337_v28  ;;  %v464_v3 = vadd.f32 %v423_v50, %v1568_v43  ;;  %v370_v32 = vcombine.high %v360_v47, %v360_v47  ;;  %1234 = vst.msk [vmem:[%s2059_s9 + $0x48] sm:$0xff] %vm83_vm0, %v178_v59 }
  0xe5   :  { %1330 = vtanh.f32 %v460_v57  ;;  %v458_v6 = vadd.f32 %v399_v56, %v1618_v58  ;;  %v411_v8 = vrot.slane %v360_v47, %v1627_v0  ;;  %v403_v9 = vrot.slane %v322_v61, %v1627_v0 }
  0xe6   :  { %1332 = vtanh.f32 %v462_v63  ;;  %v367_v12 = vrot.slane %v339_v2, %v1606_v55  ;;  %v419_v13 = vrot.slane %v370_v32, %v1627_v0  ;;  %v369_v18 = vcombine.high %v1662_v37, %v1662_v37 }
  0xe7   :  { %1334 = vtanh.f32 %v457_v62  ;;  %v461_v14 = vadd.f32 %v411_v8, %v178_v59  ;;  %v459_v58 = vadd.f32 %v403_v9, %v1637_v7 }
  0xe8   :  { %1336 = vtanh.f32 %v464_v3  ;;  %v427_v19 = vrot.slane %v367_v12, %v1627_v0  ;;  %v463_v20 = vadd.f32 %v419_v13, %v186_v53  ;;  %v371_v55 = vcombine.high %v367_v12, %v367_v12 }
  0xe9   :  { %1338 = vtanh.f32 %v458_v6  ;;  %v431_v23 = vrot.slane %v369_v18, %v1627_v0  ;;  %v590_v12 = vand.u32 127, %v278_v35  ;;  %v1748_v13 = vstv %s2062_s7 }
  0xea   :  { %v1321_v1 = vpop.eup %1320  ;;  %1340 = vtanh.f32 %v461_v14  ;;  %v465_v24 = vadd.f32 %v427_v19, %v1603_v54  ;;  %v435_v28 = vrot.slane %v371_v55, %v1627_v0 }
  0xeb   :  { %v491_v4 = vmul.f32 %v1321_v1, %v1687_v60  ;;  %1342 = vtanh.f32 %v459_v58  ;;  %v466_v33 = vadd.f32 %v431_v23, %v1554_v39 }
  0xec   :  { %v1323_v5 = vpop.eup %1322  ;;  %1344 = vtanh.f32 %v463_v20  ;;  %v467_v41 = vadd.f32 %v435_v28, %v1586_v49 }
  0xed   :  { %v507_v43 = vsel %vm83_vm0, %v491_v4, 0.0  ;;  %v492_v10 = vmul.f32 %v1323_v5, %v1687_v60  ;;  %v1325_v11 = vpop.eup %1324  ;;  %1346 = vtanh.f32 %v465_v24 }
  0xee   :  { %508 = vadd.xlane.f32.xlu0 %v507_v43  ;;  %v493_v16 = vmul.f32 %v1325_v11, %v1687_v60  ;;  %v1327_v17 = vpop.eup %1326  ;;  %1348 = vtanh.f32 %v466_v33 }
  0xef   :  { %v510_v15 = vsel %vm83_vm0, %v492_v10, 0.0  ;;  %v495_v22 = vmul.f32 %v1327_v17, %v1687_v60  ;;  %v1329_v7 = vpop.eup %1328  ;;  %1350 = vtanh.f32 %v467_v41 }
  0xf0   :  { %v513_v21 = vsel %vm83_vm0, %v493_v16, 0.0  ;;  %v494_v30 = vmul.f32 %v1329_v7, %v1687_v60  ;;  %v1757_v16 = vsub.s32 %v590_v12, %v1571_v45  ;;  %v1419_v12 = vmov 0  }
  0xf1   :  { %v519_v29 = vsel %vm83_vm0, %v495_v22, 0.0  ;;  %1315 = vset.pattern.permute.xlu1 %v1419_v12  ;;  %1314 = vset.pattern.permute.xlu0 %v1419_v12 }
  0xf2   :  { %511 = vadd.xlane.f32.xlu0 %v510_v15  ;;  %v1331_v25 = vpop.eup %1330  ;;  %v516_v37 = vsel %vm83_vm0, %v494_v30, 0.0 }
  0xf3   :  { %v1333_v26 = vpop.eup %1332  ;;  %v499_v27 = vmul.f32 %v1331_v25, %v1687_v60 }
  0xf4   :  { %v1335_v31 = vpop.eup %1334  ;;  %v501_v54 = vmul.f32 %v1333_v26, %v1687_v60 }
  0xf5   :  { %v531_v34 = vsel %vm83_vm0, %v499_v27, 0.0  ;;  %v1337_v36 = vpop.eup %1336  ;;  %v496_v38 = vmul.f32 %v1335_v31, %v1687_v60 }
  0xf6   :  { %514 = vadd.xlane.f32.xlu0 %v513_v21  ;;  %532 = vadd.xlane.f32.xlu1 %v531_v34  ;;  %v1339_v40 = vpop.eup %1338  ;;  %v537_v42 = vsel %vm83_vm0, %v501_v54, 0.0  ;;  %v503_v39 = vmul.f32 %v1337_v36, %v1687_v60 }
  0xf7   :  { %v1341_v44 = vpop.eup %1340  ;;  %v522_v46 = vsel %vm83_vm0, %v496_v38, 0.0  ;;  %v497_v47 = vmul.f32 %v1339_v40, %v1687_v60 }
  0xf8   :  { %v1343_v50 = vpop.eup %1342  ;;  %v543_v51 = vsel %vm83_vm0, %v503_v39, 0.0  ;;  %v500_v52 = vmul.f32 %v1341_v44, %v1687_v60 }
  0xf9   :  { %v1345_v49 = vpop.eup %1344  ;;  %v525_v48 = vsel %vm83_vm0, %v497_v47, 0.0  ;;  %v498_v53 = vmul.f32 %v1343_v50, %v1687_v60 }
  0xfa   :  { %520 = vadd.xlane.f32.xlu0 %v519_v29  ;;  %538 = vadd.xlane.f32.xlu1 %v537_v42  ;;  %v534_v56 = vsel %vm83_vm0, %v500_v52, 0.0  ;;  %v502_v57 = vmul.f32 %v1345_v49, %v1687_v60  ;;  %v1347_v59 = vpop.eup %1346 }
  0xfb   :  { %v528_v61 = vsel %vm83_vm0, %v498_v53, 0.0  ;;  %v504_v63 = vmul.f32 %v1347_v59, %v1687_v60  ;;  %v1349_v1 = vpop.eup %1348 }
  0xfc   :  { %v540_v62 = vsel %vm83_vm0, %v502_v57, 0.0  ;;  %v505_v3 = vmul.f32 %v1349_v1, %v1687_v60  ;;  %v1351_v32 = vpop.eup %1350 }
  0xfd   :  { %v546_v2 = vsel %vm83_vm0, %v504_v63, 0.0  ;;  %v506_v5 = vmul.f32 %v1351_v32, %v1687_v60 }
  0xfe   :  { %517 = vadd.xlane.f32.xlu0 %v516_v37  ;;  %544 = vadd.xlane.f32.xlu1 %v543_v51  ;;  %v549_v4 = vsel %vm83_vm0, %v505_v3, 0.0 }
  0xff   :  { %v552_v6 = vsel %vm83_vm0, %v506_v5, 0.0 }
 0x102   :  { %523 = vadd.xlane.f32.xlu0 %v522_v46  ;;  %535 = vadd.xlane.f32.xlu1 %v534_v56 }
 0x106   :  { %526 = vadd.xlane.f32.xlu0 %v525_v48  ;;  %541 = vadd.xlane.f32.xlu1 %v540_v62 }
 0x10a   :  { %529 = vadd.xlane.f32.xlu0 %v528_v61  ;;  %547 = vadd.xlane.f32.xlu1 %v546_v2 }
 0x10e   :  { %550 = vadd.xlane.f32.xlu1 %v549_v4 }
 0x112   :  { %553 = vadd.xlane.f32.xlu1 %v552_v6 }
 0x177   :  { %v509_v8 = vpop.xlane.xlu0 %508 }
 0x178   :  { %v1760_v17 = vadd.f32 %v1748_v13, %v509_v8 }
 0x17a   :  { %v594_v21 = vrot.slane %v1760_v17, %v1757_v16 }
 0x17b   :  { %v512_v9 = vpop.xlane.xlu0 %511 }
 0x17c   :  { %v1751_v58 = vadd.f32 %v1748_v13, %v512_v9 }
 0x17e   :  { %v598_v19 = vrot.slane %v1751_v58, %v1757_v16 }
 0x17f   :  { %v515_v43 = vpop.xlane.xlu0 %514  ;;  %v533_v11 = vpop.xlane.xlu1 %532 }
 0x180   :  { %v1754_v15 = vadd.f32 %v1748_v13, %v515_v43  ;;  %v656_v25 = vsel %vm655_vm2, %v598_v19, %v594_v21  ;;  %v1798_v38 = vadd.f32 %v1748_v13, %v533_v11 }
 0x182   :  { %v602_v55 = vrot.slane %v1754_v15, %v1757_v16  ;;  %v626_v52 = vrot.slane %v1798_v38, %v1757_v16 }
 0x183   :  { %v521_v10 = vpop.xlane.xlu0 %520  ;;  %v539_v60 = vpop.xlane.xlu1 %538 }
 0x184   :  { %v1777_v23 = vadd.f32 %v1748_v13, %v521_v10  ;;  %v658_v28 = vsel %vm657_vm3, %v602_v55, %v656_v25  ;;  %v1811_v47 = vadd.f32 %v1748_v13, %v539_v60  ;;  %v1850_v60 = vsub.s32 3, %v1571_v45 }
 0x186   :  { %v610_v31 = vrot.slane %v1777_v23, %v1757_v16  ;;  %v634_v57 = vrot.slane %v1811_v47, %v1757_v16 }
 0x187   :  { %v518_v14 = vpop.xlane.xlu0 %517  ;;  %v545_v20 = vpop.xlane.xlu1 %544 }
 0x188   :  { %v1763_v35 = vadd.f32 %v1748_v13, %v518_v14  ;;  %v569_v59 = vadd.f32 %v1748_v13, %v545_v20  ;;  %v1847_v14 = vsub.s32 2, %v1571_v45 }
 0x18a   :  { %v606_v22 = vrot.slane %v1763_v35, %v1757_v16  ;;  %v642_v3 = vrot.slane %v569_v59, %v1757_v16 }
 0x18b   :  { %v524_v18 = vpop.xlane.xlu0 %523  ;;  %v536_v26 = vpop.xlane.xlu1 %535 }
 0x18c   :  { %v1774_v7 = vadd.f32 %v1748_v13, %v524_v18  ;;  %v660_v29 = vsel %vm659_vm4, %v606_v22, %v658_v28  ;;  %v1790_v33 = vadd.f32 %v1748_v13, %v536_v26 }
 0x18d   :  { %v662_v40 = vsel %vm661_vm5, %v610_v31, %v660_v29 }
 0x18e   :  { %v614_v30 = vrot.slane %v1774_v7, %v1757_v16  ;;  %v630_v39 = vrot.slane %v1790_v33, %v1757_v16 }
 0x18f   :  { %v527_v24 = vpop.xlane.xlu0 %526  ;;  %v542_v36 = vpop.xlane.xlu1 %541 }
 0x190   :  { %v1781_v27 = vadd.f32 %v1748_v13, %v527_v24  ;;  %v664_v42 = vsel %vm663_vm6, %v614_v30, %v662_v40  ;;  %v1807_v44 = vadd.f32 %v1748_v13, %v542_v36  ;;  %v669_v48 = vsel %vm655_vm2, %v630_v39, %v626_v52 }
 0x191   :  { %v670_v63 = vsel %vm657_vm3, %v634_v57, %v669_v48  ;;  %v1863_v24 = vsub.s32 4, %v1571_v45  ;;  %v1869_v30 = vsub.s32 5, %v1571_v45 }
 0x192   :  { %v618_v34 = vrot.slane %v1781_v27, %v1757_v16  ;;  %v638_v53 = vrot.slane %v1807_v44, %v1757_v16 }
 0x193   :  { %v530_v54 = vpop.xlane.xlu0 %529  ;;  %v548_v50 = vpop.xlane.xlu1 %547 }
 0x194   :  { %v1795_v37 = vadd.f32 %v1748_v13, %v530_v54  ;;  %v666_v46 = vsel %vm665_vm7, %v618_v34, %v664_v42  ;;  %v570_v56 = vadd.f32 %v1748_v13, %v548_v50  ;;  %v671_v1 = vsel %vm659_vm4, %v638_v53, %v670_v63 }
 0x195   :  { %v672_v6 = vsel %vm661_vm5, %v642_v3, %v671_v1  ;;  %v1875_v34 = vsub.s32 6, %v1571_v45 }
 0x196   :  { %v622_v41 = vrot.slane %v1795_v37, %v1757_v16  ;;  %v646_v2 = vrot.slane %v570_v56, %v1757_v16 }
 0x197   :  { %v551_v61 = vpop.xlane.xlu1 %550 }
 0x198   :  { %v668_v51 = vsel %vm667_vm8, %v622_v41, %v666_v46  ;;  %v1825_v62 = vadd.f32 %v1748_v13, %v551_v61  ;;  %v673_v9 = vsel %vm663_vm6, %v646_v2, %v672_v6  ;;  %v1894_v61 = vsub.s32 7, %v1571_v45 }
 0x199   :  { %v679_v49 = vsel %vm678_vm9, %v668_v51, -inf }
 0x19a   :  { %680 = vmax.xlane.f32.xlu0 %v679_v49  ;;  %v650_v32 = vrot.slane %v1825_v62, %v1757_v16 }
 0x19b   :  { %v554_v4 = vpop.xlane.xlu1 %553 }
 0x19c   :  { %v1834_v5 = vadd.f32 %v1748_v13, %v554_v4  ;;  %v674_v43 = vsel %vm665_vm7, %v650_v32, %v673_v9  ;;  %v1844_v13 = vsub.s32 1, %v1571_v45 }
 0x19e   :  { %v654_v8 = vrot.slane %v1834_v5, %v1757_v16 }
 0x1a0   :  { %v675_v10 = vsel %vm667_vm8, %v654_v8, %v674_v43 }
 0x1a1   :  { %v682_v11 = vsel %vm678_vm9, %v675_v10, -inf }
 0x1a2   :  { %683 = vmax.xlane.f32.xlu1 %v682_v11 }
 0x223   :  { %v1852_v18 = vpop.xlane.xlu0 %680 }
 0x224   :  { %v690_v19 = vrot.slane %v1852_v18, %v1627_v0  ;;  %v694_v20 = vrot.slane %v1852_v18, %v1844_v13  ;;  %v698_v55 = vrot.slane %v1852_v18, %v1847_v14  ;;  %v702_v25 = vrot.slane %v1852_v18, %v1850_v60 }
 0x225   :  { %v706_v31 = vrot.slane %v1852_v18, %v1863_v24  ;;  %v710_v54 = vrot.slane %v1852_v18, %v1869_v30  ;;  %v714_v41 = vrot.slane %v1852_v18, %v1875_v34  ;;  %v718_v11 = vrot.slane %v1852_v18, %v1894_v61 }
 0x226   :  { %v767_v21 = vsub.f32 %v1760_v17, %v690_v19  ;;  %v768_v22 = vsub.f32 %v1751_v58, %v694_v20  ;;  %v769_v26 = vsub.f32 %v1754_v15, %v698_v55  ;;  %v770_v17 = vsub.f32 %v1763_v35, %v702_v25 }
 0x227   :  { %v771_v15 = vsub.f32 %v1777_v23, %v706_v31  ;;  %v772_v42 = vsub.f32 %v1774_v7, %v710_v54  ;;  %v773_v51 = vsub.f32 %v1781_v27, %v714_v41  ;;  %v774_v55 = vsub.f32 %v1795_v37, %v718_v11 }
 0x228   :  { %v783_v28 = vmul.f32 1.442695, %v767_v21  ;;  %v785_v29 = vmul.f32 1.442695, %v768_v22  ;;  %v787_v58 = vmul.f32 1.442695, %v769_v26 }
 0x229   :  { %v789_v36 = vmul.f32 1.442695, %v770_v17  ;;  %v791_v39 = vmul.f32 1.442695, %v771_v15  ;;  %v793_v52 = vmul.f32 1.442695, %v772_v42 }
 0x22a   :  { %1352 = vpow2.f32 %v783_v28  ;;  %v795_v27 = vmul.f32 1.442695, %v773_v51  ;;  %v797_v18 = vmul.f32 1.442695, %v774_v55 }
 0x22b   :  { %1354 = vpow2.f32 %v785_v29  ;;  %v684_v40 = vpop.xlane.xlu1 %683 }
 0x22c   :  { %1356 = vpow2.f32 %v787_v58  ;;  %v738_v35 = vrot.slane %v684_v40, %v1863_v24  ;;  %v742_v46 = vrot.slane %v684_v40, %v1869_v30  ;;  %v722_v23 = vrot.slane %v684_v40, %v1627_v0 }
 0x22d   :  { %1358 = vpow2.f32 %v789_v36  ;;  %v746_v48 = vrot.slane %v684_v40, %v1875_v34  ;;  %v750_v1 = vrot.slane %v684_v40, %v1894_v61  ;;  %v730_v4 = vrot.slane %v684_v40, %v1847_v14 }
 0x22e   :  { %v779_v50 = vsub.f32 %v569_v59, %v738_v35  ;;  %1360 = vpow2.f32 %v791_v39  ;;  %v780_v53 = vsub.f32 %v570_v56, %v742_v46  ;;  %v726_v59 = vrot.slane %v684_v40, %v1844_v13 }
 0x22f   :  { %1362 = vpow2.f32 %v793_v52  ;;  %v775_v63 = vsub.f32 %v1798_v38, %v722_v23  ;;  %v781_v56 = vsub.f32 %v1825_v62, %v746_v48  ;;  %v782_v6 = vsub.f32 %v1834_v5, %v750_v1 }
 0x230   :  { %v807_v57 = vmul.f32 1.442695, %v779_v50  ;;  %v809_v2 = vmul.f32 1.442695, %v780_v53  ;;  %v776_v45 = vsub.f32 %v1790_v33, %v726_v59  ;;  %v734_v9 = vrot.slane %v684_v40, %v1850_v60 }
 0x231   :  { %v799_v32 = vmul.f32 1.442695, %v775_v63  ;;  %v811_v38 = vmul.f32 1.442695, %v781_v56  ;;  %v777_v43 = vsub.f32 %v1811_v47, %v730_v4  ;;  %v813_v10 = vmul.f32 1.442695, %v782_v6 }
 0x232   :  { %1364 = vpow2.f32 %v807_v57  ;;  %v801_v62 = vmul.f32 1.442695, %v776_v45  ;;  %v778_v12 = vsub.f32 %v1807_v44, %v734_v9 }
 0x233   :  { %1366 = vpow2.f32 %v795_v27  ;;  %v803_v19 = vmul.f32 1.442695, %v777_v43 }
 0x234   :  { %1368 = vpow2.f32 %v809_v2  ;;  %v805_v21 = vmul.f32 1.442695, %v778_v12 }
 0x235   :  { %1370 = vpow2.f32 %v799_v32 }
 0x236   :  { %1372 = vpow2.f32 %v811_v38 }
 0x237   :  { %v1887_v49 = vpop.eup %1352  ;;  %1374 = vpow2.f32 %v801_v62 }
 0x238   :  { %v1890_v7 = vpop.eup %1354  ;;  %832 = vperm.xlu0 %1314, %v1887_v49   ;;  %1376 = vpow2.f32 %v813_v10 }
 0x239   :  { %835 = vperm.xlu1 %1315, %v1890_v7   ;;  %v1901_v3 = vpop.eup %1356  ;;  %1378 = vpow2.f32 %v803_v19 }
 0x23a   :  { %v1907_v8 = vpop.eup %1358  ;;  %1380 = vpow2.f32 %v805_v21 }
 0x23b   :  { %v1912_v33 = vpop.eup %1360  ;;  %1382 = vpow2.f32 %v797_v18 }
 0x23c   :  { %v1915_v5 = vpop.eup %1362 }
 0x23d   :  { %838 = vperm.xlu1 %1315, %v1901_v3  }
 0x23f   :  { %v1920_v20 = vpop.eup %1364 }
 0x240   :  { %868 = vperm.xlu0 %1314, %v1920_v20   ;;  %v1924_v47 = vpop.eup %1366 }
 0x241   :  { %841 = vperm.xlu1 %1315, %v1907_v8   ;;  %v1927_v22 = vpop.eup %1368 }
 0x242   :  { %v1931_v44 = vpop.eup %1370 }
 0x243   :  { %v1933_v25 = vpop.eup %1372 }
 0x244   :  { %871 = vperm.xlu0 %1314, %v1927_v22   ;;  %v1937_v26 = vpop.eup %1374 }
 0x245   :  { %844 = vperm.xlu1 %1315, %v1912_v33   ;;  %v1939_v37 = vpop.eup %1376 }
 0x246   :  { %v1943_v28 = vpop.eup %1378 }
 0x247   :  { %v1946_v29 = vpop.eup %1380 }
 0x248   :  { %874 = vperm.xlu0 %1314, %v1933_v25   ;;  %v1949_v31 = vpop.eup %1382 }
 0x249   :  { %847 = vperm.xlu1 %1315, %v1915_v5  }
 0x24c   :  { %877 = vperm.xlu0 %1314, %v1939_v37  }
 0x24d   :  { %850 = vperm.xlu1 %1315, %v1924_v47  }
 0x251   :  { %856 = vperm.xlu1 %1315, %v1931_v44  }
 0x255   :  { %859 = vperm.xlu1 %1315, %v1937_v26  }
 0x259   :  { %862 = vperm.xlu1 %1315, %v1943_v28  }
 0x25d   :  { %865 = vperm.xlu1 %1315, %v1946_v29  }
 0x261   :  { %853 = vperm.xlu1 %1315, %v1949_v31  }
 0x2b3   :  { %v833_v36 = vpop.permute.xlu0 %832 }
 0x2b4   :  { %v836_v17 = vpop.permute.xlu1 %835  ;;  %v882_v52 = vrot.slane %v833_v36, %v1757_v16 }
 0x2b5   :  { %v886_v23 = vrot.slane %v836_v17, %v1757_v16 }
 0x2b7   :  { %v943_v56 = vsel %vm655_vm2, %v886_v23, %v882_v52 }
 0x2b8   :  { %v839_v58 = vpop.permute.xlu1 %838 }
 0x2b9   :  { %v890_v53 = vrot.slane %v839_v58, %v1757_v16 }
 0x2bb   :  { %v869_v41 = vpop.permute.xlu0 %868  ;;  %v944_v6 = vsel %vm657_vm3, %v890_v53, %v943_v56 }
 0x2bc   :  { %v842_v54 = vpop.permute.xlu1 %841  ;;  %v930_v4 = vrot.slane %v869_v41, %v1757_v16 }
 0x2bd   :  { %v894_v27 = vrot.slane %v842_v54, %v1757_v16 }
 0x2bf   :  { %v872_v39 = vpop.permute.xlu0 %871  ;;  %v945_v10 = vsel %vm659_vm4, %v894_v27, %v944_v6 }
 0x2c0   :  { %v845_v15 = vpop.permute.xlu1 %844  ;;  %v934_v43 = vrot.slane %v872_v39, %v1757_v16 }
 0x2c1   :  { %v898_v63 = vrot.slane %v845_v15, %v1757_v16 }
 0x2c3   :  { %v875_v50 = vpop.permute.xlu0 %874  ;;  %v946_v19 = vsel %vm661_vm5, %v898_v63, %v945_v10 }
 0x2c4   :  { %v848_v40 = vpop.permute.xlu1 %847  ;;  %v938_v12 = vrot.slane %v875_v50, %v1757_v16 }
 0x2c5   :  { %v902_v2 = vrot.slane %v848_v40, %v1757_v16 }
 0x2c7   :  { %v878_v38 = vpop.permute.xlu0 %877  ;;  %v947_v17 = vsel %vm663_vm6, %v902_v2, %v946_v19 }
 0x2c8   :  { %v851_v42 = vpop.permute.xlu1 %850  ;;  %v942_v18 = vrot.slane %v878_v38, %v1757_v16 }
 0x2c9   :  { %v906_v62 = vrot.slane %v851_v42, %v1757_v16 }
 0x2cb   :  { %v948_v36 = vsel %vm665_vm7, %v906_v62, %v947_v17 }
 0x2cc   :  { %v857_v35 = vpop.permute.xlu1 %856 }
 0x2cd   :  { %v914_v59 = vrot.slane %v857_v35, %v1757_v16 }
 0x2d0   :  { %v860_v46 = vpop.permute.xlu1 %859 }
 0x2d1   :  { %v918_v48 = vrot.slane %v860_v46, %v1757_v16 }
 0x2d3   :  { %v950_v45 = vsel %vm655_vm2, %v918_v48, %v914_v59 }
 0x2d4   :  { %v863_v51 = vpop.permute.xlu1 %862 }
 0x2d5   :  { %v922_v57 = vrot.slane %v863_v51, %v1757_v16 }
 0x2d7   :  { %v951_v9 = vsel %vm657_vm3, %v922_v57, %v950_v45 }
 0x2d8   :  { %v866_v1 = vpop.permute.xlu1 %865 }
 0x2d9   :  { %v926_v32 = vrot.slane %v866_v1, %v1757_v16 }
 0x2db   :  { %v952_v11 = vsel %vm659_vm4, %v926_v32, %v951_v9 }
 0x2dc   :  { %v953_v55 = vsel %vm661_vm5, %v930_v4, %v952_v11  ;;  %v854_v21 = vpop.permute.xlu1 %853 }
 0x2dd   :  { %v910_v58 = vrot.slane %v854_v21, %v1757_v16  ;;  %v954_v54 = vsel %vm663_vm6, %v934_v43, %v953_v55 }
 0x2de   :  { %v955_v15 = vsel %vm665_vm7, %v938_v12, %v954_v54 }
 0x2df   :  { %v956_v40 = vsel %vm667_vm8, %v942_v18, %v955_v15  ;;  %v949_v41 = vsel %vm667_vm8, %v910_v58, %v948_v36 }
 0x2e0   :  { %v962_v42 = vsel %vm678_vm9, %v956_v40, 0.0  ;;  %v959_v35 = vsel %vm678_vm9, %v949_v41, 0.0 }
 0x2e1   :  { %963 = vadd.xlane.f32.xlu0 %v962_v42  ;;  %960 = vadd.xlane.f32.xlu1 %v959_v35 }
 0x36a   :  { %v964_v39 = vpop.xlane.xlu0 %963  ;;  %v961_v46 = vpop.xlane.xlu1 %960 }
 0x36b   :  { %v974_v50 = vrot.slane %v961_v46, %v1844_v13  ;;  %v970_v51 = vrot.slane %v961_v46, %v1627_v0  ;;  %v978_v52 = vrot.slane %v961_v46, %v1847_v14  ;;  %v1006_v23 = vrot.slane %v964_v39, %v1844_v13 }
 0x36c   :  { %v982_v48 = vrot.slane %v961_v46, %v1850_v60  ;;  %v1010_v53 = vrot.slane %v964_v39, %v1847_v14  ;;  %v986_v57 = vrot.slane %v961_v46, %v1863_v24  ;;  %v1014_v27 = vrot.slane %v964_v39, %v1850_v60 }
 0x36d   :  { %1384 = vrcp.f32 %v974_v50  ;;  %v990_v59 = vrot.slane %v961_v46, %v1869_v30  ;;  %v1018_v13 = vrot.slane %v964_v39, %v1863_v24  ;;  %v1002_v2 = vrot.slane %v964_v39, %v1627_v0 }
 0x36e   :  { %1386 = vrcp.f32 %v970_v51  ;;  %v1022_v32 = vrot.slane %v964_v39, %v1869_v30  ;;  %v994_v24 = vrot.slane %v961_v46, %v1875_v34  ;;  %v1026_v0 = vrot.slane %v964_v39, %v1875_v34 }
 0x36f   :  { %1388 = vrcp.f32 %v978_v52  ;;  %v998_v30 = vrot.slane %v961_v46, %v1894_v61  ;;  %v1030_v9 = vrot.slane %v964_v39, %v1894_v61 }
 0x370   :  { %1390 = vrcp.f32 %v1006_v23 }
 0x371   :  { %1392 = vrcp.f32 %v982_v48 }
 0x372   :  { %1394 = vrcp.f32 %v1010_v53 }
 0x373   :  { %1396 = vrcp.f32 %v986_v57 }
 0x374   :  { %1398 = vrcp.f32 %v1014_v27 }
 0x375   :  { %1400 = vrcp.f32 %v990_v59 }
 0x376   :  { %1402 = vrcp.f32 %v1018_v13 }
 0x377   :  { %1404 = vrcp.f32 %v1002_v2 }
 0x378   :  { %1406 = vrcp.f32 %v1022_v32 }
 0x379   :  { %1408 = vrcp.f32 %v994_v24 }
 0x37a   :  { %v1385_v63 = vpop.eup %1384  ;;  %1410 = vrcp.f32 %v1026_v0 }
 0x37b   :  { %v1387_v1 = vpop.eup %1386  ;;  %v1050_v56 = vmul.f32 %v1385_v63, %v1890_v7  ;;  %1412 = vrcp.f32 %v998_v30 }
 0x37c   :  { %v1389_v14 = vpop.eup %1388  ;;  %v1048_v45 = vmul.f32 %v1387_v1, %v1887_v49  ;;  %1414 = vrcp.f32 %v1030_v9 }
 0x37d   :  { %v1391_v60 = vpop.eup %1390  ;;  %1099 = vperm.xlu1 %1315, %v1050_v56   ;;  %v1052_v4 = vmul.f32 %v1389_v14, %v1901_v3 }
 0x37e   :  { %1096 = vperm.xlu0 %1314, %v1048_v45   ;;  %v1393_v6 = vpop.eup %1392  ;;  %v1066_v7 = vmul.f32 %v1391_v60, %v1937_v26 }
 0x37f   :  { %v1395_v38 = vpop.eup %1394  ;;  %v1054_v49 = vmul.f32 %v1393_v6, %v1907_v8 }
 0x380   :  { %v1397_v62 = vpop.eup %1396  ;;  %v1068_v3 = vmul.f32 %v1395_v38, %v1943_v28 }
 0x381   :  { %1102 = vperm.xlu1 %1315, %v1052_v4   ;;  %v1399_v43 = vpop.eup %1398  ;;  %v1056_v26 = vmul.f32 %v1397_v62, %v1912_v33 }
 0x382   :  { %1123 = vperm.xlu0 %1314, %v1066_v7   ;;  %v1401_v34 = vpop.eup %1400  ;;  %v1070_v10 = vmul.f32 %v1399_v43, %v1946_v29 }
 0x383   :  { %v1403_v8 = vpop.eup %1402  ;;  %v1058_v11 = vmul.f32 %v1401_v34, %v1915_v5 }
 0x384   :  { %v1405_v12 = vpop.eup %1404  ;;  %v1072_v28 = vmul.f32 %v1403_v8, %v1920_v20 }
 0x385   :  { %1105 = vperm.xlu1 %1315, %v1054_v49   ;;  %v1407_v19 = vpop.eup %1406  ;;  %v1064_v61 = vmul.f32 %v1405_v12, %v1931_v44 }
 0x386   :  { %1126 = vperm.xlu0 %1314, %v1068_v3   ;;  %v1409_v55 = vpop.eup %1408  ;;  %v1074_v33 = vmul.f32 %v1407_v19, %v1927_v22 }
 0x387   :  { %v1411_v21 = vpop.eup %1410  ;;  %v1060_v29 = vmul.f32 %v1409_v55, %v1924_v47 }
 0x388   :  { %v1413_v18 = vpop.eup %1412  ;;  %v1076_v17 = vmul.f32 %v1411_v21, %v1933_v25 }
 0x389   :  { %1108 = vperm.xlu1 %1315, %v1056_v26   ;;  %v1415_v5 = vpop.eup %1414  ;;  %v1062_v20 = vmul.f32 %v1413_v18, %v1949_v31 }
 0x38a   :  { %1129 = vperm.xlu0 %1314, %v1070_v10   ;;  %v1078_v58 = vmul.f32 %v1415_v5, %v1939_v37 }
 0x38d   :  { %1111 = vperm.xlu1 %1315, %v1058_v11  }
 0x38e   :  { %1132 = vperm.xlu0 %1314, %v1072_v28  }
 0x391   :  { %1120 = vperm.xlu1 %1315, %v1064_v61  }
 0x392   :  { %1135 = vperm.xlu0 %1314, %v1074_v33  }
 0x395   :  { %1114 = vperm.xlu1 %1315, %v1060_v29  }
 0x396   :  { %1138 = vperm.xlu0 %1314, %v1076_v17  }
 0x399   :  { %1117 = vperm.xlu1 %1315, %v1062_v20  }
 0x39a   :  { %1141 = vperm.xlu0 %1314, %v1078_v58  }
 0x3f8   :  { %v1100_v44 = vpop.permute.xlu1 %1099 }
 0x3f9   :  { %v1097_v54 = vpop.permute.xlu0 %1096  ;;  %v1150_v39 = vrot.slane %v1100_v44, %v1757_v16 }
 0x3fa   :  { %v1146_v46 = vrot.slane %v1097_v54, %v1757_v16 }
 0x3fc   :  { %v1103_v22 = vpop.permute.xlu1 %1102  ;;  %v1207_v63 = vsel %vm655_vm2, %v1150_v39, %v1146_v46 }
 0x3fd   :  { %v1124_v15 = vpop.permute.xlu0 %1123  ;;  %v1154_v51 = vrot.slane %v1103_v22, %v1757_v16 }
 0x3fe   :  { %v1182_v31 = vrot.slane %v1124_v15, %v1757_v16 }
 0x3ff   :  { %v1208_v14 = vsel %vm657_vm3, %v1154_v51, %v1207_v63 }
 0x400   :  { %v1106_v36 = vpop.permute.xlu1 %1105 }
 0x401   :  { %v1127_v40 = vpop.permute.xlu0 %1126  ;;  %v1158_v23 = vrot.slane %v1106_v36, %v1757_v16 }
 0x402   :  { %v1186_v52 = vrot.slane %v1127_v40, %v1757_v16 }
 0x403   :  { %v1209_v4 = vsel %vm659_vm4, %v1158_v23, %v1208_v14 }
 0x404   :  { %v1109_v41 = vpop.permute.xlu1 %1108 }
 0x405   :  { %v1130_v47 = vpop.permute.xlu0 %1129  ;;  %v1162_v57 = vrot.slane %v1109_v41, %v1757_v16 }
 0x406   :  { %v1190_v48 = vrot.slane %v1130_v47, %v1757_v16 }
 0x407   :  { %v1210_v6 = vsel %vm661_vm5, %v1162_v57, %v1209_v4 }
 0x408   :  { %v1112_v42 = vpop.permute.xlu1 %1111 }
 0x409   :  { %v1133_v35 = vpop.permute.xlu0 %1132  ;;  %v1166_v1 = vrot.slane %v1112_v42, %v1757_v16 }
 0x40a   :  { %v1194_v27 = vrot.slane %v1133_v35, %v1757_v16 }
 0x40b   :  { %v1211_v38 = vsel %vm663_vm6, %v1166_v1, %v1210_v6 }
 0x40c   :  { %v1121_v25 = vpop.permute.xlu1 %1120 }
 0x40d   :  { %v1178_v37 = vrot.slane %v1121_v25, %v1757_v16  ;;  %v1136_v50 = vpop.permute.xlu0 %1135 }
 0x40e   :  { %v1198_v32 = vrot.slane %v1136_v50, %v1757_v16 }
 0x40f   :  { %v1214_v53 = vsel %vm655_vm2, %v1182_v31, %v1178_v37 }
 0x410   :  { %v1215_v59 = vsel %vm657_vm3, %v1186_v52, %v1214_v53  ;;  %v1115_v13 = vpop.permute.xlu1 %1114 }
 0x411   :  { %v1216_v56 = vsel %vm659_vm4, %v1190_v48, %v1215_v59  ;;  %v1139_v2 = vpop.permute.xlu0 %1138  ;;  %v1170_v60 = vrot.slane %v1115_v13, %v1757_v16 }
 0x412   :  { %v1217_v45 = vsel %vm661_vm5, %v1194_v27, %v1216_v56  ;;  %v1202_v24 = vrot.slane %v1139_v2, %v1757_v16 }
 0x413   :  { %v1218_v7 = vsel %vm663_vm6, %v1198_v32, %v1217_v45  ;;  %v1212_v62 = vsel %vm665_vm7, %v1170_v60, %v1211_v38 }
 0x414   :  { %v1118_v0 = vpop.permute.xlu1 %1117  ;;  %v1219_v9 = vsel %vm665_vm7, %v1202_v24, %v1218_v7 }
 0x415   :  { %v1174_v49 = vrot.slane %v1118_v0, %v1757_v16  ;;  %v1142_v30 = vpop.permute.xlu0 %1141 }
 0x416   :  { %v1206_v3 = vrot.slane %v1142_v30, %v1757_v16 }
 0x417   :  { %v1213_v43 = vsel %vm667_vm8, %v1174_v49, %v1212_v62 }
 0x418   :  { %1223 = vst.msk [vmem:[%s2063_s8] sm:$0xff] %vm678_vm9, %v1213_v43  ;;  %v1220_v26 = vsel %vm667_vm8, %v1206_v3, %v1219_v9 }
 0x419   :  { %1224 = vst.msk [vmem:[%s2063_s8 + $0x8] sm:$0xff] %vm678_vm9, %v1220_v26 }

</bundles_post_ra>
